<compile_context>
chip_gen: v6e
topology: v6e:2x2x1
jax: 0.10.0
libtpu: 0.0.40
codegen_flags: <defaults>
</compile_context>

<pallas_src>
import math

import jax
import jax.numpy as jnp
from jax.experimental import pallas as pl
from jax.experimental.pallas import tpu as pltpu

FEATURE_NUM = 32   # `feature_num` is undefined in the original module; stand-in value.
HIDDEN = 256
BATCH = 8


# ----------------------------------------------------------------------------
# Shared kernel body (used by both the single-shot and the gridded entry point).
# Weight dtype (f32 or bf16) is taken from the refs; activations are cast to
# match so the MXU sees homogeneous operands, accumulation is always f32.
# ----------------------------------------------------------------------------
def critic_kernel(x_ref, w1_ref, b1_ref, w2_ref, b2_ref, w3r_ref, b3_ref, o_ref):
    x = x_ref[...].astype(w1_ref.dtype)                                    # (B, F)  tiny cast
    h1 = jnp.dot(x, w1_ref[...], preferred_element_type=jnp.float32)      # (B, 256) f32 acc
    h1 = jnp.maximum(h1 + b1_ref[...], 0.0)                               # bias+ReLU in f32
    h2 = jnp.dot(h1.astype(w2_ref.dtype), w2_ref[...],
                 preferred_element_type=jnp.float32)                      # (B, 256) f32 acc
    h2 = jnp.maximum(h2 + b2_ref[...], 0.0)
    # Final 256 -> 1 projection: VPU multiply + XLU lane reduce (no N=1 MXU pass).
    v = jnp.sum(h2 * w3r_ref[...], axis=-1, keepdims=True)                # (B, 1)
    o_ref[...] = v + b3_ref[0, 0]                                         # scalar bias from SMEM


# ----------------------------------------------------------------------------
# Single-shot entry point (no grid): the latency-bound deployment shape.
# At B=8, F=32 the kernel is weight-DMA / launch-latency bound, so a grid would
# only add per-step overhead; bf16-stored weights (pack_params default) are the
# main lever here since they halve the bytes on the critical path.
# ----------------------------------------------------------------------------
def critic_forward(state, packed_params):
    w1, b1, w2, b2, w3_row, b3 = packed_params
    B = state.shape[0]
    vmem = pl.BlockSpec(memory_space=pltpu.MemorySpace.VMEM)
    smem = pl.BlockSpec(memory_space=pltpu.MemorySpace.SMEM)
    return pl.pallas_call(
        critic_kernel,
        out_shape=jax.ShapeDtypeStruct((B, 1), jnp.float32),
        in_specs=[vmem, vmem, vmem, vmem, vmem, vmem, smem],
        out_specs=vmem,
    )(state, w1, b1, w2, b2, w3_row, b3)


# ----------------------------------------------------------------------------
# Batched / gridded entry point: rollout or training batches.
# Weights stay VMEM-resident across batch tiles (constant index_map); the batch
# axis is "parallel" (megacore on v7x).  Default tile_b=256 fills a 256-wide
# MXU pass; use 512-1024 for very large batches, and keep B/tile_b even on v7x.
# ----------------------------------------------------------------------------
def critic_forward_batched(state, packed_params, *, tile_b=256):
    w1, b1, w2, b2, w3_row, b3 = packed_params
    B, F = state.shape
    H = w1.shape[1]
    assert B % tile_b == 0, "batch must be a multiple of tile_b"
    grid = (B // tile_b,)

    resident = lambda i: (0, 0)  # same block every step -> stays VMEM-resident
    return pl.pallas_call(
        critic_kernel,
        out_shape=jax.ShapeDtypeStruct((B, 1), jnp.float32),
        grid_spec=pltpu.PrefetchScalarGridSpec(
            num_scalar_prefetch=0,
            grid=grid,
            in_specs=[
                pl.BlockSpec((tile_b, F), lambda i: (i, 0)),        # x: one batch tile / step
                pl.BlockSpec((F, H), resident),                     # w1 (bf16 or f32, as stored)
                pl.BlockSpec((1, H), resident),                     # b1 (f32)
                pl.BlockSpec((H, H), resident),                     # w2 (bf16 or f32, as stored)
                pl.BlockSpec((1, H), resident),                     # b2 (f32)
                pl.BlockSpec((1, H), resident),                     # w3 row (f32)
                pl.BlockSpec(memory_space=pltpu.MemorySpace.SMEM),  # b3 scalar
            ],
            out_specs=pl.BlockSpec((tile_b, 1), lambda i: (i, 0)),
        ),
        compiler_params=pltpu.CompilerParams(
            dimension_semantics=("parallel",),  # shard batch tiles across TensorCores (v7x)
        ),
    )(state, w1, b1, w2, b2, w3_row, b3)


# ----------------------------------------------------------------------------
# Params: PyTorch nn.Linear default init, stored (in, out); packing casts the
# two big weight matrices to the storage dtype ONCE (wrapper-side, not per call).
# ----------------------------------------------------------------------------
def init_params(key):
    """f32 master params; nn.Linear default init U[-1/sqrt(fan_in), +1/sqrt(fan_in)]."""
    def linear(k, fan_in, fan_out):
        kw, kb = jax.random.split(k)
        bound = 1.0 / math.sqrt(fan_in)
        w = jax.random.uniform(kw, (fan_in, fan_out), jnp.float32, -bound, bound)
        b = jax.random.uniform(kb, (1, fan_out), jnp.float32, -bound, bound)
        return w, b

    k1, k2, k3 = jax.random.split(key, 3)
    w1, b1 = linear(k1, FEATURE_NUM, HIDDEN)
    w2, b2 = linear(k2, HIDDEN, HIDDEN)
    w3, b3 = linear(k3, HIDDEN, 1)
    w3_row = w3.reshape(1, HIDDEN)   # pre-pack once for the VPU+XLU head
    return (w1, b1, w2, b2, w3_row, b3)


def pack_params(params, weights_dtype=jnp.bfloat16):
    """Cast w1/w2 to the HBM storage dtype ONCE; biases / w3_row / b3 stay f32."""
    w1, b1, w2, b2, w3_row, b3 = params
    # TODO(synk): on v7x, w2 could additionally be stored fp8 e4m3 + per-tensor
    # scale (native MXU fp8) to halve its bytes again; validate value-head accuracy first.
    return (w1.astype(weights_dtype), b1, w2.astype(weights_dtype), b2, w3_row, b3)


def critic_reference(state, params):
    w1, b1, w2, b2, w3_row, b3 = params
    h1 = jnp.maximum(state @ w1 + b1, 0.0)
    h2 = jnp.maximum(h1 @ w2 + b2, 0.0)
    return h2 @ w3_row.T + b3


if __name__ == "__main__":
    key = jax.random.PRNGKey(0)
    kx_small, kx_big, kp = jax.random.split(key, 3)
    params_f32 = init_params(kp)
    packed_bf16 = pack_params(params_f32, jnp.bfloat16)   # default deployment packing
    packed_f32 = pack_params(params_f32, jnp.float32)     # exact packing (for tight checks)

    # 1) Single-shot path (deployment shape, no grid), f32-stored weights: exact.
    state_small = jax.random.normal(kx_small, (BATCH, FEATURE_NUM), jnp.float32)
    ref_small = critic_reference(state_small, params_f32)
    out_small_f32 = jax.block_until_ready(critic_forward(state_small, packed_f32))
    assert out_small_f32.shape == (BATCH, 1)
    assert jnp.allclose(out_small_f32, ref_small, atol=1e-5, rtol=1e-5)

    # 2) Single-shot path, bf16-stored weights (half the weight DMA bytes).
    out_small_bf16 = jax.block_until_ready(critic_forward(state_small, packed_bf16))
    assert jnp.allclose(out_small_bf16, ref_small, atol=5e-2, rtol=5e-2)

    # 3) Batched gridded path: B=512, tile_b=256 -> grid of 2 (even, feeds both v7x TCs).
    B_big = 512
    state_big = jax.random.normal(kx_big, (B_big, FEATURE_NUM), jnp.float32)
    ref_big = critic_reference(state_big, params_f32)

    out_big_f32 = jax.block_until_ready(
        critic_forward_batched(state_big, packed_f32, tile_b=256))
    assert out_big_f32.shape == (B_big, 1)
    assert jnp.allclose(out_big_f32, ref_big, atol=1e-5, rtol=1e-5)

    out_big_bf16 = jax.block_until_ready(
        critic_forward_batched(state_big, packed_bf16, tile_b=256))
    assert jnp.allclose(out_big_bf16, ref_big, atol=5e-2, rtol=5e-2)

    print("KERNEL_OK")
</pallas_src>

<mosaic_0001>
module attributes {stable_mosaic.version = 11 : i64} {
  func.func @critic_kernel(%arg0: memref<8x32xf32, #tpu.memory_space<vmem>>, %arg1: memref<32x256xf32, #tpu.memory_space<vmem>>, %arg2: memref<1x256xf32, #tpu.memory_space<vmem>>, %arg3: memref<256x256xf32, #tpu.memory_space<vmem>>, %arg4: memref<1x256xf32, #tpu.memory_space<vmem>>, %arg5: memref<1x256xf32, #tpu.memory_space<vmem>>, %arg6: memref<1x1xf32, #tpu.memory_space<smem>>, %arg7: memref<8x1xf32, #tpu.memory_space<vmem>>) attributes {dimension_semantics = [], scalar_prefetch = 0 : i64, scratch_operands = 0 : i64, tpu.core_type = #tpu.core_type<tc>} {
    %c0 = arith.constant 0 : index
    %c0_0 = arith.constant 0 : index
    %0 = vector.load %arg0[%c0, %c0_0] : memref<8x32xf32, #tpu.memory_space<vmem>>, vector<8x32xf32>
    %c0_1 = arith.constant 0 : index
    %c0_2 = arith.constant 0 : index
    %1 = vector.load %arg1[%c0_1, %c0_2] : memref<32x256xf32, #tpu.memory_space<vmem>>, vector<32x256xf32>
    %cst = arith.constant dense<0.000000e+00> : vector<8x256xf32>
    %2 = tpu.matmul %0, %1, %cst {dimension_numbers = #tpu.dot_dimension_numbers<[1], [0], [0], [1], [0, 0, 1, 1], [], []>} : vector<8x32xf32>, vector<32x256xf32>, vector<8x256xf32> -> vector<8x256xf32>
    %c0_3 = arith.constant 0 : index
    %c0_4 = arith.constant 0 : index
    %3 = vector.load %arg2[%c0_3, %c0_4] : memref<1x256xf32, #tpu.memory_space<vmem>>, vector<1x256xf32>
    %4 = vector.broadcast %3 : vector<1x256xf32> to vector<8x256xf32>
    %5 = arith.addf %2, %4 : vector<8x256xf32>
    %cst_5 = arith.constant 0.000000e+00 : f32
    %6 = vector.broadcast %cst_5 : f32 to vector<8x256xf32>
    %7 = arith.maximumf %5, %6 : vector<8x256xf32>
    %c0_6 = arith.constant 0 : index
    %c0_7 = arith.constant 0 : index
    %8 = vector.load %arg3[%c0_6, %c0_7] : memref<256x256xf32, #tpu.memory_space<vmem>>, vector<256x256xf32>
    %cst_8 = arith.constant dense<0.000000e+00> : vector<8x256xf32>
    %9 = tpu.matmul %7, %8, %cst_8 {dimension_numbers = #tpu.dot_dimension_numbers<[1], [0], [0], [1], [0, 0, 1, 1], [], []>} : vector<8x256xf32>, vector<256x256xf32>, vector<8x256xf32> -> vector<8x256xf32>
    %c0_9 = arith.constant 0 : index
    %c0_10 = arith.constant 0 : index
    %10 = vector.load %arg4[%c0_9, %c0_10] : memref<1x256xf32, #tpu.memory_space<vmem>>, vector<1x256xf32>
    %11 = vector.broadcast %10 : vector<1x256xf32> to vector<8x256xf32>
    %12 = arith.addf %9, %11 : vector<8x256xf32>
    %cst_11 = arith.constant 0.000000e+00 : f32
    %13 = vector.broadcast %cst_11 : f32 to vector<8x256xf32>
    %14 = arith.maximumf %12, %13 : vector<8x256xf32>
    %c0_12 = arith.constant 0 : index
    %c0_13 = arith.constant 0 : index
    %15 = vector.load %arg5[%c0_12, %c0_13] : memref<1x256xf32, #tpu.memory_space<vmem>>, vector<1x256xf32>
    %16 = vector.broadcast %15 : vector<1x256xf32> to vector<8x256xf32>
    %17 = arith.mulf %14, %16 : vector<8x256xf32>
    %cst_14 = arith.constant dense<0.000000e+00> : vector<8xf32>
    %18 = vector.multi_reduction <add>, %17, %cst_14 [1] : vector<8x256xf32> to vector<8xf32>
    %19 = vector.shape_cast %18 : vector<8xf32> to vector<8x1xf32>
    %c0_15 = arith.constant 0 : index
    %c0_16 = arith.constant 0 : index
    %20 = memref.load %arg6[%c0_15, %c0_16] : memref<1x1xf32, #tpu.memory_space<smem>>
    %21 = vector.broadcast %20 : f32 to vector<8x1xf32>
    %22 = arith.addf %19, %21 : vector<8x1xf32>
    %c0_17 = arith.constant 0 : index
    %c0_18 = arith.constant 0 : index
    %23 = vector.load %arg7[%c0_17, %c0_18] : memref<8x1xf32, #tpu.memory_space<vmem>>, vector<8x1xf32>
    tpu.vector_store %arg7[%c0_17, %c0_18], %22 {strides = array<i32>} : memref<8x1xf32, #tpu.memory_space<vmem>>, vector<8x1xf32>,
    return
  }
}

</mosaic_0001>

<bundles_post_ra>
// kernel: tpu_custom_call.1
= control target key start
LH: loop header
LB: loop body
LE: loop exit
PB: predicated region body
PF: predicated region fallthrough
CT: control target
= control target key end

     0   :  { %13 = vsyncpa [#allocation4], 0  ;;  %s482_s0 = inlined_call_operand.hbm [shape: f32[8,32], index: 0, kind: input, shape index: {}]   ;;  %s483_s1 = inlined_call_operand.hbm [shape: f32[32,256], index: 1, kind: input, shape index: {}]   ;;  %s484_s2 = inlined_call_operand.vmem [shape: f32[1,256], index: 2, kind: input, shape index: {}]   ;;  %s485_s3 = inlined_call_operand.hbm [shape: f32[256,256], index: 3, kind: input, shape index: {}]   ;;  %s486_s4 = inlined_call_operand.vmem [shape: f32[1,256], index: 4, kind: input, shape index: {}]   ;;  %s487_s5 = inlined_call_operand.vmem [shape: f32[1,256], index: 5, kind: input, shape index: {}]   ;;  %s488_s6 = inlined_call_operand.<no memory space> [shape: f32[1,1], index: 6, kind: input, shape index: {}]   ;;  %s489_s7 = inlined_call_operand.vmem [shape: f32[8,1], index: 7, kind: output, shape index: {}]  }
   0x1   :  { %14 = vsyncpa [#allocation6], 0  ;;  %s412_s24 = smov [#allocation5]  }
   0x2   :  { %s30_s25 = sshll.u32 %s412_s24, 4  ;;  %s31_s25 = int_to_ptr.vmem [resolvable:$true] %s30_s25 }
   0x3   :  { %s356_s26 = scalar_lea.vmem %s31_s25, 1024  ;;  %p361_p1 = scmp.lt.s32.totalorder %s31_s25, %s31_s25 }
   0x4   :  { %p357_p0 = scmp.ne.s32.totalorder %s31_s25, %s356_s26  ;;  %p362_p2 = scmp.lt.s32.totalorder %s356_s26, %s356_s26 }
   0x6   :  { %p363_p3 = por %p362_p2, %p361_p1 }
   0x8   :  { %p364_p4 = pnand %p363_p3, %p357_p0 }
   0xa   :  { %367 = shalt.err (!%p364_p4)
}
   0xb   :  { %s413_s27 = smov 256   ;;  %s414_s28 = smov 16  }
   0xc   :  { %36 = dma.hbm_to_vmem [thread:$0]  %s483_s1, 1024, %s31_s25, [#allocation6], %s413_s27, %s413_s27, %s414_s28  }
   0xd   :  { %s415_s8 = smov [#allocation3]   ;;  %s416_s10 = smov [#allocation7]  }
   0xe   :  { %s21_s9 = sshll.u32 %s415_s8, 4  ;;  %s44_s11 = sshll.u32 %s416_s10, 4  ;;  %s22_s9 = int_to_ptr.vmem [resolvable:$true] %s21_s9  ;;  %s45_s11 = int_to_ptr.vmem [resolvable:$true] %s44_s11 }
   0xf   :  { %s376_s12 = scalar_lea.vmem %s22_s9, 128  ;;  %p381_p6 = scmp.lt.s32.totalorder %s22_s9, %s22_s9 }
  0x10   :  { %p377_p5 = scmp.ne.s32.totalorder %s22_s9, %s376_s12  ;;  %p382_p7 = scmp.lt.s32.totalorder %s376_s12, %s376_s12 }
  0x12   :  { %p383_p8 = por %p382_p7, %p381_p6 }
  0x14   :  { %p384_p9 = pnand %p383_p8, %p377_p5 }
  0x16   :  { %387 = shalt.err (!%p384_p9)
}
  0x17   :  { %24 = dma.hbm_to_vmem [thread:$0]  %s482_s0, 128, %s22_s9, [#allocation4]  }
  0x18   :  { %s396_s15 = scalar_lea.vmem %s45_s11, 8192  ;;  %p401_p11 = scmp.lt.s32.totalorder %s45_s11, %s45_s11 }
  0x19   :  { %p397_p10 = scmp.ne.s32.totalorder %s45_s11, %s396_s15  ;;  %p402_p12 = scmp.lt.s32.totalorder %s396_s15, %s396_s15 }
  0x1b   :  { %p403_p13 = por %p402_p12, %p401_p11 }
  0x1d   :  { %p404_p0 = pnand %p403_p13, %p397_p10 }
  0x1f   :  { %407 = shalt.err (!%p404_p0)
}
  0x20   :  { %50 = dma.hbm_to_vmem [thread:$0]  %s485_s3, 8192, %s45_s11, [#allocation6], %s413_s27, %s413_s27, %s414_s28  }
  0x21   :  { %408 = dma.done.wait [#allocation4], 128  }
  0x22   :  { %409 = vsyncadd [#allocation4], 4294967168 }
  0x23   :  { %410 = dma.done.wait [#allocation6], 9216  }
  0x24   :  { %411 = vsyncadd [#allocation6], 4294958080  ;;  %v417_v0 = vmov 0.0   ;;  %v74_v1 = vld [vmem:[#allocation5 + $0x38] sm:$0xff]  ;;  %v73_v2 = vld [vmem:[#allocation5 + $0x30] sm:$0xff]  ;;  %vm87_vm0 = vcmask 261120  }
  0x25   :  { %155 = vmatprep.mubr.f32.mxu0 %v417_v0  ;;  %v72_v3 = vld [vmem:[#allocation5 + $0x28] sm:$0xff]  ;;  %115 = vmatprep.subr.mxu0 %v74_v1  ;;  %v71_v4 = vld [vmem:[#allocation5 + $0x20] sm:$0xff]  ;;  %v70_v5 = vld [vmem:[#allocation5 + $0x18] sm:$0xff]  ;;  %vm333_vm1 = vcmask 7168  }
  0x26   :  { %116 = vmatpush1.msra.mxu0 %v73_v2  ;;  %v69_v6 = vld [vmem:[#allocation5 + $0x10] sm:$0xff]  ;;  %v195_v7 = vld [vmem:[#allocation7 + $0xf8] sm:$0xff]  ;;  %v193_v9 = vld [vmem:[#allocation7 + $0xe8] sm:$0xff] }
  0x27   :  { %117 = vmatprep.subr.mxu0 %v72_v3  ;;  %v194_v8 = vld [vmem:[#allocation7 + $0xf0] sm:$0xff]  ;;  %v68_v10 = vld [vmem:[#allocation5 + $0x8] sm:$0xff]  ;;  %240 = vmatprep.subr.mxu1 %v195_v7  ;;  %v192_v11 = vld [vmem:[#allocation7 + $0xe0] sm:$0xff] }
  0x28   :  { %118 = vmatpush1.msra.mxu0 %v71_v4  ;;  %v67_v12 = vld [vmem:[#allocation5] sm:$0xff]  ;;  %241 = vmatpush1.msra.mxu1 %v194_v8  ;;  %v191_v13 = vld [vmem:[#allocation7 + $0xd8] sm:$0xff]  ;;  %v190_v15 = vld [vmem:[#allocation7 + $0xd0] sm:$0xff] }
  0x29   :  { %119 = vmatprep.subr.mxu0 %v70_v5  ;;  %v66_v14 = vld [vmem:[#allocation3] sm:$0xff]  ;;  %242 = vmatprep.subr.mxu1 %v193_v9  ;;  %v189_v16 = vld [vmem:[#allocation7 + $0xc8] sm:$0xff]  ;;  %v188_v17 = vld [vmem:[#allocation7 + $0xc0] sm:$0xff] }
  0x2a   :  { %120 = vmatpush1.msra.mxu0 %v69_v6  ;;  %243 = vmatpush1.msra.mxu1 %v192_v11  ;;  %v187_v18 = vld [vmem:[#allocation7 + $0xb8] sm:$0xff]  ;;  %v186_v19 = vld [vmem:[#allocation7 + $0xb0] sm:$0xff]  ;;  %v185_v20 = vld [vmem:[#allocation7 + $0xa8] sm:$0xff] }
  0x2b   :  { %121 = vmatprep.subr.mxu0 %v68_v10  ;;  %244 = vmatprep.subr.mxu1 %v191_v13  ;;  %v184_v21 = vld [vmem:[#allocation7 + $0xa0] sm:$0xff]  ;;  %v183_v22 = vld [vmem:[#allocation7 + $0x98] sm:$0xff]  ;;  %v182_v23 = vld [vmem:[#allocation7 + $0x90] sm:$0xff]  ;;  %v77_v10 = vlaneseq }
  0x2c   :  { %122 = vmatpush1.msra.mxu0 %v67_v12  ;;  %245 = vmatpush1.msra.mxu1 %v190_v15  ;;  %v181_v24 = vld [vmem:[#allocation7 + $0x88] sm:$0xff]  ;;  %v180_v25 = vld [vmem:[#allocation7 + $0x80] sm:$0xff]  ;;  %v179_v26 = vld [vmem:[#allocation7 + $0x78] sm:$0xff] }
  0x2d   :  { %341 = vmatmul.mubr.msk.f32.vlgmr.msra.gmra.mxu0 %vm87_vm0, %v66_v14  ;;  %246 = vmatprep.subr.mxu1 %v189_v16  ;;  %v178_v27 = vld [vmem:[#allocation7 + $0x70] sm:$0xff]  ;;  %v177_v28 = vld [vmem:[#allocation7 + $0x68] sm:$0xff]  ;;  %v176_v29 = vld [vmem:[#allocation7 + $0x60] sm:$0xff]  ;;  %v78_v11 = vshrl.u32 %v77_v10, 7 }
  0x2e   :  { %247 = vmatpush1.msra.mxu1 %v188_v17  ;;  %v175_v30 = vld [vmem:[#allocation7 + $0x58] sm:$0xff]  ;;  %v174_v31 = vld [vmem:[#allocation7 + $0x50] sm:$0xff]  ;;  %v173_v32 = vld [vmem:[#allocation7 + $0x48] sm:$0xff] }
  0x2f   :  { %248 = vmatprep.subr.mxu1 %v187_v18  ;;  %v172_v33 = vld [vmem:[#allocation7 + $0x40] sm:$0xff]  ;;  %v171_v34 = vld [vmem:[#allocation7 + $0x38] sm:$0xff]  ;;  %v170_v35 = vld [vmem:[#allocation7 + $0x30] sm:$0xff]  ;;  %v79_v12 = vsub.s32 0, %v78_v11  ;;  %v83_v14 = vsub.s32 1, %v78_v11 }
  0x30   :  { %249 = vmatpush1.msra.mxu1 %v186_v19  ;;  %v169_v36 = vld [vmem:[#allocation7 + $0x28] sm:$0xff]  ;;  %v168_v37 = vld [vmem:[#allocation7 + $0x20] sm:$0xff]  ;;  %v167_v38 = vld [vmem:[#allocation7 + $0x18] sm:$0xff] }
  0x31   :  { %250 = vmatprep.subr.mxu1 %v185_v20  ;;  %v166_v39 = vld [vmem:[#allocation7 + $0x10] sm:$0xff]  ;;  %v165_v40 = vld [vmem:[#allocation7 + $0x8] sm:$0xff]  ;;  %v164_v41 = vld [vmem:[#allocation7] sm:$0xff] }
  0x32   :  { %251 = vmatpush1.msra.mxu1 %v184_v21  ;;  %v227_v42 = vld [vmem:[#allocation7 + $0x1f8] sm:$0xff]  ;;  %v226_v43 = vld [vmem:[#allocation7 + $0x1f0] sm:$0xff]  ;;  %v225_v44 = vld [vmem:[#allocation7 + $0x1e8] sm:$0xff] }
  0x33   :  { %252 = vmatprep.subr.mxu1 %v183_v22  ;;  %v224_v45 = vld [vmem:[#allocation7 + $0x1e0] sm:$0xff]  ;;  %v223_v46 = vld [vmem:[#allocation7 + $0x1d8] sm:$0xff]  ;;  %v222_v47 = vld [vmem:[#allocation7 + $0x1d0] sm:$0xff] }
  0x34   :  { %253 = vmatpush1.msra.mxu1 %v182_v23  ;;  %v221_v48 = vld [vmem:[#allocation7 + $0x1c8] sm:$0xff]  ;;  %v220_v49 = vld [vmem:[#allocation7 + $0x1c0] sm:$0xff]  ;;  %v219_v50 = vld [vmem:[#allocation7 + $0x1b8] sm:$0xff] }
  0x35   :  { %254 = vmatprep.subr.mxu1 %v181_v24  ;;  %v218_v51 = vld [vmem:[#allocation7 + $0x1b0] sm:$0xff]  ;;  %v217_v52 = vld [vmem:[#allocation7 + $0x1a8] sm:$0xff]  ;;  %v216_v53 = vld [vmem:[#allocation7 + $0x1a0] sm:$0xff] }
  0x36   :  { %255 = vmatpush1.msra.mxu1 %v180_v25  ;;  %v215_v54 = vld [vmem:[#allocation7 + $0x198] sm:$0xff]  ;;  %v214_v55 = vld [vmem:[#allocation7 + $0x190] sm:$0xff]  ;;  %v213_v56 = vld [vmem:[#allocation7 + $0x188] sm:$0xff] }
  0x37   :  { %256 = vmatprep.subr.mxu1 %v179_v26  ;;  %v212_v57 = vld [vmem:[#allocation7 + $0x180] sm:$0xff]  ;;  %v211_v58 = vld [vmem:[#allocation7 + $0x178] sm:$0xff]  ;;  %v210_v59 = vld [vmem:[#allocation7 + $0x170] sm:$0xff] }
  0x38   :  { %257 = vmatpush1.msra.mxu1 %v178_v27  ;;  %v209_v60 = vld [vmem:[#allocation7 + $0x168] sm:$0xff]  ;;  %v208_v61 = vld [vmem:[#allocation7 + $0x160] sm:$0xff]  ;;  %v207_v62 = vld [vmem:[#allocation7 + $0x158] sm:$0xff] }
  0x39   :  { %258 = vmatprep.subr.mxu1 %v177_v28  ;;  %v206_v63 = vld [vmem:[#allocation7 + $0x150] sm:$0xff]  ;;  %v205_v0 = vld [vmem:[#allocation7 + $0x148] sm:$0xff]  ;;  %v204_v1 = vld [vmem:[#allocation7 + $0x140] sm:$0xff] }
  0x3a   :  { %259 = vmatpush1.msra.mxu1 %v176_v29  ;;  %v203_v2 = vld [vmem:[#allocation7 + $0x138] sm:$0xff]  ;;  %v202_v3 = vld [vmem:[#allocation7 + $0x130] sm:$0xff]  ;;  %v201_v4 = vld [vmem:[#allocation7 + $0x128] sm:$0xff] }
  0x3b   :  { %260 = vmatprep.subr.mxu1 %v175_v30  ;;  %v200_v5 = vld [vmem:[#allocation7 + $0x120] sm:$0xff]  ;;  %v199_v6 = vld [vmem:[#allocation7 + $0x118] sm:$0xff]  ;;  %v198_v7 = vld [vmem:[#allocation7 + $0x110] sm:$0xff] }
  0x3c   :  { %261 = vmatpush1.msra.mxu1 %v174_v31  ;;  %v197_v8 = vld [vmem:[#allocation7 + $0x108] sm:$0xff]  ;;  %v196_v9 = vld [vmem:[#allocation7 + $0x100] sm:$0xff]  ;;  %v75_v13 = vld [vmem:[%s484_s2] sm:$0x3] }
  0x3d   :  { %262 = vmatprep.subr.mxu1 %v173_v32  ;;  %v80_v15 = vrot.slane %v75_v13, %v79_v12  ;;  %v84_v16 = vrot.slane %v75_v13, %v83_v14  ;;  %v228_v23 = vld [vmem:[%s486_s4] sm:$0x3] }
  0x3e   :  { %263 = vmatpush1.msra.mxu1 %v172_v33  ;;  %v233_v24 = vrot.slane %v228_v23, %v79_v12  ;;  %v237_v25 = vrot.slane %v228_v23, %v83_v14  ;;  %v313_v27 = vld [vmem:[%s487_s5] sm:$0x3] }
  0x3f   :  { %264 = vmatprep.subr.mxu1 %v171_v34  ;;  %v318_v32 = vrot.slane %v313_v27, %v79_v12  ;;  %v322_v33 = vrot.slane %v313_v27, %v83_v14 }
  0x40   :  { %265 = vmatpush1.msra.mxu1 %v170_v35 }
  0x41   :  { %266 = vmatprep.subr.mxu1 %v169_v36 }
  0x42   :  { %267 = vmatpush1.msra.mxu1 %v168_v37 }
  0x43   :  { %268 = vmatprep.subr.mxu1 %v167_v38  ;;  %v331_v38 = vstv %s488_s6 }
  0x44   :  { %269 = vmatpush1.msra.mxu1 %v166_v39 }
  0x45   :  { %270 = vmatprep.subr.mxu1 %v165_v40 }
  0x46   :  { %271 = vmatpush1.msra.mxu1 %v164_v41 }
  0x47   :  { %272 = vmatprep.subr.mxu1 %v227_v42 }
  0x48   :  { %273 = vmatpush2.msra.mxu1 %v226_v43 }
  0x49   :  { %274 = vmatprep.subr.mxu1 %v225_v44 }
  0x4a   :  { %275 = vmatpush2.msra.mxu1 %v224_v45 }
  0x4b   :  { %276 = vmatprep.subr.mxu1 %v223_v46 }
  0x4c   :  { %277 = vmatpush2.msra.mxu1 %v222_v47 }
  0x4d   :  { %278 = vmatprep.subr.mxu1 %v221_v48 }
  0x4e   :  { %279 = vmatpush2.msra.mxu1 %v220_v49 }
  0x4f   :  { %280 = vmatprep.subr.mxu1 %v219_v50 }
  0x50   :  { %281 = vmatpush2.msra.mxu1 %v218_v51 }
  0x51   :  { %282 = vmatprep.subr.mxu1 %v217_v52 }
  0x52   :  { %283 = vmatpush2.msra.mxu1 %v216_v53 }
  0x53   :  { %284 = vmatprep.subr.mxu1 %v215_v54 }
  0x54   :  { %285 = vmatpush2.msra.mxu1 %v214_v55 }
  0x55   :  { %286 = vmatprep.subr.mxu1 %v213_v56 }
  0x56   :  { %287 = vmatpush2.msra.mxu1 %v212_v57 }
  0x57   :  { %288 = vmatprep.subr.mxu1 %v211_v58 }
  0x58   :  { %289 = vmatpush2.msra.mxu1 %v210_v59 }
  0x59   :  { %290 = vmatprep.subr.mxu1 %v209_v60 }
  0x5a   :  { %291 = vmatpush2.msra.mxu1 %v208_v61 }
  0x5b   :  { %292 = vmatprep.subr.mxu1 %v207_v62 }
  0x5c   :  { %293 = vmatpush2.msra.mxu1 %v206_v63 }
  0x5d   :  { %294 = vmatprep.subr.mxu1 %v205_v0 }
  0x5e   :  { %295 = vmatpush2.msra.mxu1 %v204_v1 }
  0x5f   :  { %296 = vmatprep.subr.mxu1 %v203_v2 }
  0x60   :  { %297 = vmatpush2.msra.mxu1 %v202_v3 }
  0x61   :  { %298 = vmatprep.subr.mxu1 %v201_v4 }
  0x62   :  { %299 = vmatpush2.msra.mxu1 %v200_v5 }
  0x63   :  { %300 = vmatprep.subr.mxu1 %v199_v6 }
  0x64   :  { %301 = vmatpush2.msra.mxu1 %v198_v7 }
  0x65   :  { %302 = vmatprep.subr.mxu1 %v197_v8 }
  0x66   :  { %303 = vmatpush2.msra.mxu1 %v196_v9 }
  0xed   :  { %v157_v17 = vpop.f32.mrf.mxu0 }
  0xee   :  { %v158_v18 = vadd.f32 %v157_v17, %v80_v15 }
  0xef   :  { %v159_v19 = vpop.f32.mrf.mxu0 }
  0xf0   :  { %v160_v20 = vadd.f32 %v159_v19, %v84_v16  ;;  %v162_v22 = vmax.f32 %v158_v18, 0.0 }
  0xf2   :  { %v163_v21 = vmax.f32 %v160_v20, 0.0 }
  0xf4   :  { %304 = vmatprep.mubr.f32.mxu1 %v163_v21 }
  0xf5   :  { %305 = vmatmul.mubr.f32.vlgmr.msra.gmra.mxu1 %v162_v22 }
 0x1b5   :  { %v306_v26 = vpop.f32.mrf.mxu1 }
 0x1b6   :  { %v307_v28 = vadd.f32 %v306_v26, %v233_v24 }
 0x1b7   :  { %v308_v29 = vpop.f32.mrf.mxu1 }
 0x1b8   :  { %v311_v30 = vmax.f32 %v307_v28, 0.0  ;;  %v309_v31 = vadd.f32 %v308_v29, %v237_v25 }
 0x1ba   :  { %v312_v34 = vmax.f32 %v309_v31, 0.0  ;;  %v325_v35 = vmul.f32 %v318_v32, %v311_v30 }
 0x1bc   :  { %v326_v36 = vmul.f32 %v322_v33, %v312_v34 }
 0x1be   :  { %v327_v37 = vadd.f32 %v326_v36, %v325_v35 }
 0x1c0   :  { %328 = vadd.xlane.f32.xlu0 %v327_v37 }
 0x249   :  { %v329_v39 = vpop.xlane.xlu0 %328 }
 0x24a   :  { %v332_v40 = vadd.f32 %v331_v38, %v329_v39 }
 0x24c   :  { %334 = vst.msk [vmem:[%s489_s7] sm:$0xff] %vm333_vm1, %v332_v40 }
 0x24d   :  { %339 = vsyncpa [#allocation4], 1 }
 0x24e   :  { %340 = vsyncpa [#allocation6], 1 }

</bundles_post_ra>
